<compile_context>
chip_gen: v6e
topology: v6e:2x2x1
jax: 0.10.0
libtpu: 0.0.40
codegen_flags: <defaults>
</compile_context>

<pallas_src>
import functools

import jax
import jax.numpy as jnp
from jax.experimental import pallas as pl
from jax.experimental.pallas import tpu as pltpu

_EPS = 1e-5


def _round_up(v, m):
    return ((v + m - 1) // m) * m


def _cdiv(a, b):
    return -(-a // b)


def _conv_bn_relu_kernel(x_ref, w_ref, b_ref, mask_ref, o_ref, stack_ref,
                         *, wp, m_tile, halo_pad):
    """Fused 3x3 conv (single K=9*Cin matmul) + folded BN/affine bias + ReLU + zero-mask.

    x_ref:    (1, Cin, P)       bf16  whole padded+flattened image, VMEM resident
    w_ref:    (Cout, 9*Cin)     bf16  BN/affine-folded conv taps, tap-major
    b_ref:    (Cout, 1)         f32   folded bias (beta - mean*scale)
    mask_ref: (1, M_tile)       f32   1.0 at valid output positions, 0.0 at pad/tail
    o_ref:    (1, Cout, M_tile) bf16  lane-dense output tile
    stack_ref:(9*Cin, M_tile)   bf16  scratch: stacked shifted tap views
    """
    m = pl.program_id(1)
    base = pl.multiple_of(m * m_tile, 128)              # lane-aligned dynamic offset
    # One aligned, lane-multiple dynamic load of tile+halo; taps are static slices of it.
    window = x_ref[0, :, pl.ds(base, m_tile + halo_pad)]  # (Cin, M_tile+halo_pad) bf16

    cin = x_ref.shape[1]
    for k in range(9):                                   # statically unrolled
        off = (k // 3) * wp + (k % 3)                    # static shift of the flat image
        stack_ref[k * cin:(k + 1) * cin, :] = window[:, off:off + m_tile]

    # Single MXU matmul, K = 9*Cin, f32 accumulation.
    acc = jnp.dot(w_ref[...], stack_ref[...], preferred_element_type=jnp.float32)
    # bias + ReLU + zero invalid (padded-column / tail) positions -- all in f32.
    res = jnp.maximum(acc + b_ref[...], 0.0) * mask_ref[...]
    o_ref[0] = res.astype(o_ref.dtype)                   # single cast at the store


@functools.partial(jax.jit, static_argnames=("dataset", "m_tile", "layout"))
def conv_bn_relu(x_nchw, conv_w, run_mean, run_var, aff_w, aff_b,
                 dataset=0, m_tile=None, layout="nchw"):
    """Forward pass of ConvBNReLU (inference path, == feats[0] of the module).

    layout="nchw":        returns (N, Cout, H, W) bf16 (module semantics; wrapper slice).
    layout="padded_flat": returns (N, Cout, m_pad) bf16 lane-dense, no epilogue pass;
                          pixel (h, w) lives at flat index h*(W+2) + w + 1, all padded
                          columns and the tail are exact zeros (zeroed in-kernel).
    """
    del dataset  # n_bn == 1 -> module clamps dataset to 0, single BN
    N, Cin, H, W = x_nchw.shape
    Cout, Cin2, KH, KW = conv_w.shape
    assert (KH, KW) == (3, 3) and Cin2 == Cin
    Hp, Wp = H + 2, W + 2

    # ---- balanced tiling over flattened padded rows (rows 0..H-1, all Wp columns) ----
    hw = H * Wp
    if m_tile is None:
        target = 2048
        num_m = max(1, _cdiv(hw, target))
        if N == 1 and num_m == 1 and hw > 128:
            num_m = 2                                     # v7x megacore: >=2 parallel tiles
        m_tile = _round_up(_cdiv(hw, num_m), 128)
    assert m_tile % 128 == 0
    num_m = _cdiv(hw, m_tile)
    m_pad = num_m * m_tile
    halo = 2 * Wp + 2                                     # max tap shift
    halo_pad = _round_up(halo, 128)                       # lane-multiple window load
    P = m_pad + halo_pad                                  # flat input length (zero padded)

    # ---- fold BN(eval) + affine into weights/bias (f32), cast weights to bf16 ----
    scale = aff_w.astype(jnp.float32) * jax.lax.rsqrt(run_var.astype(jnp.float32) + _EPS)
    bias = aff_b.astype(jnp.float32) - run_mean.astype(jnp.float32) * scale
    w_fold = conv_w.astype(jnp.float32) * scale[:, None, None, None]   # (Cout,Cin,3,3)
    # tap-major layout matching the stacked operand: row k*Cin + c  <->  (kh, kw, c)
    w2 = jnp.transpose(w_fold, (0, 2, 3, 1)).reshape(Cout, KH * KW * Cin)
    w2 = w2.astype(jnp.bfloat16)
    bias2 = bias.reshape(Cout, 1)

    # ---- validity mask over flat output positions (pad columns + tail -> 0) ----
    pos = jnp.arange(m_pad)
    col = pos % Wp
    mask = ((pos < hw) & (col >= 1) & (col <= W)).astype(jnp.float32).reshape(1, m_pad)

    # ---- pad + flatten input (channel-major, long spatial axis on lanes), bf16 ----
    # TODO(synk): this wrapper pad/reshape pass could move in-kernel via manual DMA once
    # input traffic dominates; output traffic was the bigger share and is now bf16.
    xp = jnp.pad(x_nchw, ((0, 0), (0, 0), (1, 1), (1, 1)))        # (N, Cin, Hp, Wp)
    xf = xp.reshape(N, Cin, Hp * Wp)
    xe = jnp.pad(xf, ((0, 0), (0, 0), (1, P - 1 - Hp * Wp)))      # shift by 1 + tail zeros
    xe = xe.astype(jnp.bfloat16)                                  # (N, Cin, P)

    kernel = functools.partial(_conv_bn_relu_kernel, wp=Wp, m_tile=m_tile,
                               halo_pad=halo_pad)
    out = pl.pallas_call(
        kernel,
        out_shape=jax.ShapeDtypeStruct((N, Cout, m_pad), jnp.bfloat16),
        grid_spec=pltpu.PrefetchScalarGridSpec(
            num_scalar_prefetch=0,
            grid=(N, num_m),
            in_specs=[
                # whole padded image: block index constant over m -> stays VMEM resident
                pl.BlockSpec((1, Cin, P), lambda n, m: (n, 0, 0)),
                pl.BlockSpec((Cout, KH * KW * Cin), lambda n, m: (0, 0)),
                pl.BlockSpec((Cout, 1), lambda n, m: (0, 0)),
                pl.BlockSpec((1, m_tile), lambda n, m: (0, m)),
            ],
            out_specs=pl.BlockSpec((1, Cout, m_tile), lambda n, m: (n, 0, m)),
            scratch_shapes=[pltpu.VMEM((KH * KW * Cin, m_tile), jnp.bfloat16)],
        ),
        compiler_params=pltpu.CompilerParams(
            dimension_semantics=("parallel", "parallel"),
            # > v5e's 16 MiB default scoped VMEM, < v7x's 64 MiB physical VMEM.
            vmem_limit_bytes=48 * 1024 * 1024,
        ),
    )(xe, w2, bias2, mask)

    if layout == "padded_flat":
        return out                                        # no HBM epilogue pass
    # ---- (N, Cout, H*Wp) -> NCHW via pure slicing (no transpose) ----
    return out[:, :, :hw].reshape(N, Cout, H, Wp)[:, :, :, 1:W + 1]


def _reference_f32(x, conv_w, mean, var, gamma, beta):
    """Plain-JAX f32 reference replicating the PyTorch forward (inference path)."""
    feat = jax.lax.conv_general_dilated(
        x, conv_w, (1, 1), ((1, 1), (1, 1)),
        dimension_numbers=("NCHW", "OIHW", "NCHW"),
        precision=jax.lax.Precision.HIGHEST)
    feat = (feat - mean[None, :, None, None]) * jax.lax.rsqrt(
        var[None, :, None, None] + _EPS)
    feat = feat * gamma[None, :, None, None] + beta[None, :, None, None]
    return jnp.maximum(feat, 0.0)


def _reference_bf16(x, conv_w, mean, var, gamma, beta):
    """Same math but with the kernel's bf16 operand quantization (f32 fold, f32 acc)."""
    scale = gamma.astype(jnp.float32) * jax.lax.rsqrt(var.astype(jnp.float32) + _EPS)
    bias = beta.astype(jnp.float32) - mean.astype(jnp.float32) * scale
    w_fold = conv_w.astype(jnp.float32) * scale[:, None, None, None]
    w_q = w_fold.astype(jnp.bfloat16).astype(jnp.float32)
    x_q = x.astype(jnp.bfloat16).astype(jnp.float32)
    feat = jax.lax.conv_general_dilated(
        x_q, w_q, (1, 1), ((1, 1), (1, 1)),
        dimension_numbers=("NCHW", "OIHW", "NCHW"),
        precision=jax.lax.Precision.HIGHEST)
    return jnp.maximum(feat + bias[None, :, None, None], 0.0)


if __name__ == "__main__":
    # Module config: ConvBNReLU(in_chan=4, out_chan=8, ks=3, stride=1, padding=1)
    N, Cin, H, W = 2, 4, 16, 16
    Cout = 8
    Wp, hw = W + 2, H * (W + 2)

    key = jax.random.PRNGKey(0)
    kx, kw, kg, kb, km, kv = jax.random.split(key, 6)

    x = jax.random.normal(kx, (N, Cin, H, W), jnp.float32)
    conv_w = jax.random.normal(kw, (Cout, Cin, 3, 3), jnp.float32) * 0.1
    affine_weight = jax.random.normal(kg, (Cout,), jnp.float32) * 0.5 + 1.0
    affine_bias = jax.random.normal(kb, (Cout,), jnp.float32) * 0.1
    running_mean = jax.random.normal(km, (Cout,), jnp.float32) * 0.1
    running_var = jax.random.uniform(kv, (Cout,), jnp.float32, 0.5, 1.5)

    ref_q = _reference_bf16(x, conv_w, running_mean, running_var,
                            affine_weight, affine_bias)
    ref_f = _reference_f32(x, conv_w, running_mean, running_var,
                           affine_weight, affine_bias)

    # Default tiling (balanced; single M tile per image at this toy size), NCHW output.
    feats = conv_bn_relu(x, conv_w, running_mean, running_var,
                         affine_weight, affine_bias, dataset=0)
    feats = jax.block_until_ready(feats)
    assert feats.shape == (N, Cout, H, W), feats.shape
    feats_f = feats.astype(jnp.float32)
    assert bool(jnp.allclose(feats_f, ref_q, atol=3e-2, rtol=3e-2)), (
        float(jnp.max(jnp.abs(feats_f - ref_q))))
    assert bool(jnp.allclose(feats_f, ref_f, atol=8e-2, rtol=8e-2)), (
        float(jnp.max(jnp.abs(feats_f - ref_f))))

    # Smaller M tile -> multi-block grid per image (exercises the tiled/halo path).
    feats2 = conv_bn_relu(x, conv_w, running_mean, running_var,
                          affine_weight, affine_bias, dataset=0, m_tile=128)
    feats2 = jax.block_until_ready(feats2).astype(jnp.float32)
    assert bool(jnp.allclose(feats2, ref_q, atol=3e-2, rtol=3e-2)), (
        float(jnp.max(jnp.abs(feats2 - ref_q))))

    # Epilogue-free lane-dense padded-flat layout (pad columns / tail zeroed in-kernel).
    feats_pf = conv_bn_relu(x, conv_w, running_mean, running_var,
                            affine_weight, affine_bias, dataset=0,
                            layout="padded_flat")
    feats_pf = jax.block_until_ready(feats_pf)
    m_pad = feats_pf.shape[-1]
    assert m_pad % 128 == 0 and m_pad >= hw
    pf_img = feats_pf[:, :, :hw].astype(jnp.float32).reshape(N, Cout, H, Wp)
    assert bool(jnp.allclose(pf_img[:, :, :, 1:W + 1], ref_q, atol=3e-2, rtol=3e-2)), (
        float(jnp.max(jnp.abs(pf_img[:, :, :, 1:W + 1] - ref_q))))
    assert bool(jnp.all(pf_img[:, :, :, 0] == 0.0))          # left pad column zeroed
    assert bool(jnp.all(pf_img[:, :, :, W + 1] == 0.0))      # right pad column zeroed
    assert bool(jnp.all(feats_pf[:, :, hw:] == 0))           # tail zeroed

    print("KERNEL_OK")
</pallas_src>

<mosaic_0001>
module attributes {stable_mosaic.version = 11 : i64} {
  func.func @_conv_bn_relu_kernel(%arg0: i32, %arg1: i32, %arg2: memref<1x4x512xbf16, #tpu.memory_space<vmem>>, %arg3: memref<8x36xbf16, #tpu.memory_space<vmem>>, %arg4: memref<8x1xf32, #tpu.memory_space<vmem>>, %arg5: memref<1x384xf32, #tpu.memory_space<vmem>>, %arg6: memref<1x8x384xbf16, #tpu.memory_space<vmem>>, %arg7: memref<36x384xbf16, #tpu.memory_space<vmem>>) attributes {dimension_semantics = [#tpu.dimension_semantics<parallel>, #tpu.dimension_semantics<parallel>], iteration_bounds = array<i64: 2, 1>, scalar_prefetch = 0 : i64, scratch_operands = 1 : i64, tpu.core_type = #tpu.core_type<tc>, window_params = [{transform_indices = @transform_0, window_bounds = array<i64: 1, 4, 512>}, {pipeline_mode = #tpu.pipeline_mode<synchronous>, transform_indices = @transform_1, window_bounds = array<i64: 8, 36>}, {pipeline_mode = #tpu.pipeline_mode<synchronous>, transform_indices = @transform_2, window_bounds = array<i64: 8, 1>}, {transform_indices = @transform_3, window_bounds = array<i64: 1, 384>}, {transform_indices = @transform_4, window_bounds = array<i64: 1, 8, 384>}]} {
    %c384_i32 = arith.constant 384 : i32
    %0 = arith.muli %arg1, %c384_i32 : i32
    %1 = tpu.assume_multiple %0, 128 : i32
    %c0 = arith.constant 0 : index
    %c0_0 = arith.constant 0 : index
    %2 = arith.index_cast %1 : i32 to index
    %3 = vector.load %arg2[%c0, %c0_0, %2] : memref<1x4x512xbf16, #tpu.memory_space<vmem>>, vector<1x4x512xbf16>
    %4 = vector.shape_cast %3 : vector<1x4x512xbf16> to vector<4x512xbf16>
    %5 = vector.extract_strided_slice %4 {offsets = [0, 0], sizes = [4, 384], strides = [1, 1]} : vector<4x512xbf16> to vector<4x384xbf16>
    %c0_1 = arith.constant 0 : index
    %c0_2 = arith.constant 0 : index
    %6 = vector.load %arg7[%c0_1, %c0_2] : memref<36x384xbf16, #tpu.memory_space<vmem>>, vector<4x384xbf16>
    tpu.vector_store %arg7[%c0_1, %c0_2], %5 {strides = array<i32>} : memref<36x384xbf16, #tpu.memory_space<vmem>>, vector<4x384xbf16>,
    %7 = vector.extract_strided_slice %4 {offsets = [0, 1], sizes = [4, 384], strides = [1, 1]} : vector<4x512xbf16> to vector<4x384xbf16>
    %c4 = arith.constant 4 : index
    %c0_3 = arith.constant 0 : index
    %8 = vector.load %arg7[%c4, %c0_3] : memref<36x384xbf16, #tpu.memory_space<vmem>>, vector<4x384xbf16>
    tpu.vector_store %arg7[%c4, %c0_3], %7 {strides = array<i32>} : memref<36x384xbf16, #tpu.memory_space<vmem>>, vector<4x384xbf16>,
    %9 = vector.extract_strided_slice %4 {offsets = [0, 2], sizes = [4, 384], strides = [1, 1]} : vector<4x512xbf16> to vector<4x384xbf16>
    %c8 = arith.constant 8 : index
    %c0_4 = arith.constant 0 : index
    %10 = vector.load %arg7[%c8, %c0_4] : memref<36x384xbf16, #tpu.memory_space<vmem>>, vector<4x384xbf16>
    tpu.vector_store %arg7[%c8, %c0_4], %9 {strides = array<i32>} : memref<36x384xbf16, #tpu.memory_space<vmem>>, vector<4x384xbf16>,
    %11 = vector.extract_strided_slice %4 {offsets = [0, 18], sizes = [4, 384], strides = [1, 1]} : vector<4x512xbf16> to vector<4x384xbf16>
    %c12 = arith.constant 12 : index
    %c0_5 = arith.constant 0 : index
    %12 = vector.load %arg7[%c12, %c0_5] : memref<36x384xbf16, #tpu.memory_space<vmem>>, vector<4x384xbf16>
    tpu.vector_store %arg7[%c12, %c0_5], %11 {strides = array<i32>} : memref<36x384xbf16, #tpu.memory_space<vmem>>, vector<4x384xbf16>,
    %13 = vector.extract_strided_slice %4 {offsets = [0, 19], sizes = [4, 384], strides = [1, 1]} : vector<4x512xbf16> to vector<4x384xbf16>
    %c16 = arith.constant 16 : index
    %c0_6 = arith.constant 0 : index
    %14 = vector.load %arg7[%c16, %c0_6] : memref<36x384xbf16, #tpu.memory_space<vmem>>, vector<4x384xbf16>
    tpu.vector_store %arg7[%c16, %c0_6], %13 {strides = array<i32>} : memref<36x384xbf16, #tpu.memory_space<vmem>>, vector<4x384xbf16>,
    %15 = vector.extract_strided_slice %4 {offsets = [0, 20], sizes = [4, 384], strides = [1, 1]} : vector<4x512xbf16> to vector<4x384xbf16>
    %c20 = arith.constant 20 : index
    %c0_7 = arith.constant 0 : index
    %16 = vector.load %arg7[%c20, %c0_7] : memref<36x384xbf16, #tpu.memory_space<vmem>>, vector<4x384xbf16>
    tpu.vector_store %arg7[%c20, %c0_7], %15 {strides = array<i32>} : memref<36x384xbf16, #tpu.memory_space<vmem>>, vector<4x384xbf16>,
    %17 = vector.extract_strided_slice %4 {offsets = [0, 36], sizes = [4, 384], strides = [1, 1]} : vector<4x512xbf16> to vector<4x384xbf16>
    %c24 = arith.constant 24 : index
    %c0_8 = arith.constant 0 : index
    %18 = vector.load %arg7[%c24, %c0_8] : memref<36x384xbf16, #tpu.memory_space<vmem>>, vector<4x384xbf16>
    tpu.vector_store %arg7[%c24, %c0_8], %17 {strides = array<i32>} : memref<36x384xbf16, #tpu.memory_space<vmem>>, vector<4x384xbf16>,
    %19 = vector.extract_strided_slice %4 {offsets = [0, 37], sizes = [4, 384], strides = [1, 1]} : vector<4x512xbf16> to vector<4x384xbf16>
    %c28 = arith.constant 28 : index
    %c0_9 = arith.constant 0 : index
    %20 = vector.load %arg7[%c28, %c0_9] : memref<36x384xbf16, #tpu.memory_space<vmem>>, vector<4x384xbf16>
    tpu.vector_store %arg7[%c28, %c0_9], %19 {strides = array<i32>} : memref<36x384xbf16, #tpu.memory_space<vmem>>, vector<4x384xbf16>,
    %21 = vector.extract_strided_slice %4 {offsets = [0, 38], sizes = [4, 384], strides = [1, 1]} : vector<4x512xbf16> to vector<4x384xbf16>
    %c32 = arith.constant 32 : index
    %c0_10 = arith.constant 0 : index
    %22 = vector.load %arg7[%c32, %c0_10] : memref<36x384xbf16, #tpu.memory_space<vmem>>, vector<4x384xbf16>
    tpu.vector_store %arg7[%c32, %c0_10], %21 {strides = array<i32>} : memref<36x384xbf16, #tpu.memory_space<vmem>>, vector<4x384xbf16>,
    %c0_11 = arith.constant 0 : index
    %c0_12 = arith.constant 0 : index
    %23 = vector.load %arg3[%c0_11, %c0_12] : memref<8x36xbf16, #tpu.memory_space<vmem>>, vector<8x36xbf16>
    %c0_13 = arith.constant 0 : index
    %c0_14 = arith.constant 0 : index
    %24 = vector.load %arg7[%c0_13, %c0_14] : memref<36x384xbf16, #tpu.memory_space<vmem>>, vector<36x384xbf16>
    %cst = arith.constant dense<0.000000e+00> : vector<8x384xf32>
    %25 = tpu.matmul %23, %24, %cst {dimension_numbers = #tpu.dot_dimension_numbers<[1], [0], [0], [1], [0, 0, 1, 1], [], []>} : vector<8x36xbf16>, vector<36x384xbf16>, vector<8x384xf32> -> vector<8x384xf32>
    %c0_15 = arith.constant 0 : index
    %c0_16 = arith.constant 0 : index
    %26 = vector.load %arg4[%c0_15, %c0_16] : memref<8x1xf32, #tpu.memory_space<vmem>>, vector<8x1xf32>
    %27 = vector.broadcast %26 : vector<8x1xf32> to vector<8x384xf32>
    %28 = arith.addf %25, %27 : vector<8x384xf32>
    %cst_17 = arith.constant 0.000000e+00 : f32
    %29 = vector.broadcast %cst_17 : f32 to vector<8x384xf32>
    %30 = arith.maximumf %28, %29 : vector<8x384xf32>
    %c0_18 = arith.constant 0 : index
    %c0_19 = arith.constant 0 : index
    %31 = vector.load %arg5[%c0_18, %c0_19] : memref<1x384xf32, #tpu.memory_space<vmem>>, vector<1x384xf32>
    %32 = vector.broadcast %31 : vector<1x384xf32> to vector<8x384xf32>
    %33 = arith.mulf %30, %32 : vector<8x384xf32>
    %34 = arith.truncf %33 : vector<8x384xf32> to vector<8x384xbf16>
    %c0_20 = arith.constant 0 : index
    %c0_21 = arith.constant 0 : index
    %c0_22 = arith.constant 0 : index
    %35 = vector.load %arg6[%c0_20, %c0_21, %c0_22] : memref<1x8x384xbf16, #tpu.memory_space<vmem>>, vector<1x8x384xbf16>
    %36 = vector.shape_cast %35 : vector<1x8x384xbf16> to vector<8x384xbf16>
    %37 = vector.shape_cast %34 : vector<8x384xbf16> to vector<1x8x384xbf16>
    tpu.vector_store %arg6[%c0_20, %c0_21, %c0_22], %37 {strides = array<i32>} : memref<1x8x384xbf16, #tpu.memory_space<vmem>>, vector<1x8x384xbf16>,
    return
  }
  func.func @transform_0(%arg0: i32, %arg1: i32) -> (i32, i32, i32) {
    %c0_i32 = arith.constant 0 : i32
    %c0_i32_0 = arith.constant 0 : i32
    %c0_i32_1 = arith.constant 0 : i32
    return %arg0, %c0_i32, %c0_i32_0 : i32, i32, i32
  }
  func.func @transform_1(%arg0: i32, %arg1: i32) -> (i32, i32) {
    %c0_i32 = arith.constant 0 : i32
    %c0_i32_0 = arith.constant 0 : i32
    %c0_i32_1 = arith.constant 0 : i32
    return %c0_i32, %c0_i32_0 : i32, i32
  }
  func.func @transform_2(%arg0: i32, %arg1: i32) -> (i32, i32) {
    %c0_i32 = arith.constant 0 : i32
    %c0_i32_0 = arith.constant 0 : i32
    %c0_i32_1 = arith.constant 0 : i32
    return %c0_i32, %c0_i32_0 : i32, i32
  }
  func.func @transform_3(%arg0: i32, %arg1: i32) -> (i32, i32) {
    %c0_i32 = arith.constant 0 : i32
    %c0_i32_0 = arith.constant 0 : i32
    return %c0_i32, %arg1 : i32, i32
  }
  func.func @transform_4(%arg0: i32, %arg1: i32) -> (i32, i32, i32) {
    %c0_i32 = arith.constant 0 : i32
    %c0_i32_0 = arith.constant 0 : i32
    return %arg0, %c0_i32, %arg1 : i32, i32, i32
  }
}

</mosaic_0001>

<bundles_post_ra>
// kernel: conv_bn_relu.1
= control target key start
LH: loop header
LB: loop body
LE: loop exit
PB: predicated region body
PF: predicated region fallthrough
CT: control target
= control target key end

     0   :  { %s827_s15 = smov 0   ;;  %s829_s16 = smov 0   ;;  %s898_s0 = inlined_call_operand.vmem [shape: bf16[2,4,512], index: 0, kind: input, shape index: {}]   ;;  %s899_s1 = inlined_call_operand.vmem [shape: bf16[8,36], index: 1, kind: input, shape index: {}]   ;;  %s900_s2 = inlined_call_operand.vmem [shape: f32[8,1], index: 2, kind: input, shape index: {}]   ;;  %s901_s3 = inlined_call_operand.vmem [shape: f32[1,384], index: 3, kind: input, shape index: {}]   ;;  %s902_s4 = inlined_call_operand.vmem [shape: bf16[2,8,384], index: 4, kind: output, shape index: {}]  }
   0x1   :  { %s831_s17 = smov 0  }
   0x2 LB: > { %s26_s18 = sadd.s32 1, %s784_s16  ;;  %p678_p0 = scmp.ge.s32.totalorder %s788_s17, 1  ;;  %s788_s17 = sphi %s831_s17, %s14_s17   ;;  %s784_s16 = sphi %s829_s16, %s904_s16   ;;  %s780_s15 = sphi %s827_s15, %s903_s15  }
   0x3   : > { %p28_p1 = scmp.ge.s32.totalorder %s26_s18, 2  ;;  %p186_p2 = scmp.lt.s32.totalorder %s788_s17, 3 }
   0x5   : > { %s906_s18 = smov (%p28_p1, %s26_s18), 0  ;;  %p187_p3 = pnand %p678_p0, %p186_p2 }
   0x6   : > { %p220_p4 = scmp.lt.s32.totalorder (!%p187_p3), %s780_s15, 1  ;;  %s791_s23 = smov (!%p187_p3), 109  }
   0x7   : > { %190 = sbr.rel (%p187_p3) target bundleno = 384 (0x180), region = 36  ;;  %s792_s24 = smov (!%p187_p3), 90  }
   0x8   : > { %s794_s25 = smov (!%p187_p3), 108   ;;  %s795_s26 = smov (!%p187_p3), 92  }
   0x9   : > { %s796_s27 = smov (!%p187_p3), 91   ;;  %s797_s28 = smov (!%p187_p3), 127  }
   0xa   : > { %s798_s29 = smov (!%p187_p3), 126   ;;  %s799_s30 = smov (!%p187_p3), 110  }
   0xc   : > { %v252_v0 = vlaneseq  ;;  %v790_v1 = vmov 1983009808   ;;  %s908_s15 = smov (!%p220_p4, %s780_s15), 1  ;;  %v793_v11 = vmov 0.0   ;;  %vm800_vm0 = vmmov 0   ;;  %v399_v14 = vld [vmem:[%s900_s2] sm:$0xff] }
   0xd   : > { %v250_v2 = vunpack.c.l.s4 %v790_v1  ;;  %s700_s19 = sshll.u32 %s908_s15, 3  ;;  %707 = vmatprep.subr.bf16.mxu1 %v793_v11  ;;  %713 = vmatprep.mubr.msk.bf16.mxu1 %vm800_vm0, %v793_v11  ;;  %v801_v13 = vmov 0   ;;  %vm339_vm1 = vcmask 883712   ;;  %vm281_vm2 = vcmask 1043456   ;;  %s717_s11 = smul.u32 12, %s908_s15 }
   0xe   : > { %v847_v3 = vshrl.u32 %v252_v0, 7  ;;  %s224_s22 = scalar_lea.vmem %s898_s0, %s700_s19  ;;  %491 = vmatprep.mubr.bf16.mxu0 %v801_v13  ;;  %754 = vset.pattern.permute.xlu0 %v801_v13  ;;  %vm381_vm3 = vcmask 736256   ;;  %vm325_vm4 = vcmask 891904   ;;  %vm353_vm5 = vcmask 752640  }
   0xf   : > { %v251_v4 = vunpack.c.0.s8 %v250_v2  ;;  %v246_v6 = vld [vmem:[%s224_s22] sm:$0xff]  ;;  %vm449_vm6 = vcmask 1041408   ;;  %vm367_vm7 = vcmask 744448   ;;  %vm283_vm8 = vcmask 1039360   ;;  %s238_s14 = scalar_lea.vmem %s902_s4, %s717_s11 }
  0x10   : > { %682 = vst.sshfl [vmem:[#allocation2] sm:$0xf pattern:$0x76325410] %v246_v6  ;;  %v248_v8 = vcombine.high %v246_v6, %v246_v6  ;;  %v267_v10 = vcombine.low %v246_v6, %v246_v6  ;;  %vm297_vm9 = vcmask 1031168   ;;  %vm311_vm10 = vcmask 900096  }
  0x11   : > { %v254_v5 = vsub.s32 %v251_v4, %v847_v3  ;;  %vm445_vm11 = vcmask 293888  }
  0x12   : > { %683 = vst.sshfl [vmem:[#allocation2 + $0x8] sm:$0x3 pattern:$0x76325410] %v248_v8 }
  0x13   : > { %v255_v7 = vrot.slane %v246_v6, %v254_v5  ;;  %v262_v9 = vrot.slane %v248_v8, %v254_v5  ;;  %v274_v12 = vrot.slane %v267_v10, %v254_v5 }
  0x15   : > { %318 = vrot.lane.b32.xlu1 %v255_v7, %s791_s23  ;;  %374 = vrot.lane.b32.xlu0 %v255_v7, %s792_s24 }
  0x19   : > { %334 = vrot.lane.b32.xlu1 %v255_v7, %s794_s25  ;;  %376 = vrot.lane.b32.xlu0 %v262_v9, %s792_s24 }
  0x1d   : > { %320 = vrot.lane.b32.xlu1 %v262_v9, %s791_s23  ;;  %332 = vrot.lane.b32.xlu0 %v274_v12, %s794_s25 }
  0x21   : > { %348 = vrot.lane.b32.xlu1 %v262_v9, %s795_s26  ;;  %346 = vrot.lane.b32.xlu0 %v255_v7, %s795_s26 }
  0x25   : > { %362 = vrot.lane.b32.xlu1 %v255_v7, %s796_s27  ;;  %360 = vrot.lane.b32.xlu0 %v274_v12, %s796_s27 }
  0x29   : > { %277 = vrot.lane.b32.xlu1 %v255_v7, %s797_s28  ;;  %275 = vrot.lane.b32.xlu0 %v274_v12, %s797_s28 }
  0x2d   : > { %292 = vrot.lane.b32.xlu1 %v262_v9, %s798_s29  ;;  %290 = vrot.lane.b32.xlu0 %v255_v7, %s798_s29 }
  0x31   : > { %306 = vrot.lane.b32.xlu1 %v255_v7, %s799_s30  ;;  %304 = vrot.lane.b32.xlu0 %v274_v12, %s799_s30 }
  0x35   : > { %402 = vperm.xlu0 %754, %v399_v14  }
  0x87   : > { %v319_v15 = vpop.permute.xlu1 %318  ;;  %v375_v16 = vpop.permute.xlu0 %374 }
  0x88   : > { %v378_v19 = vrot.slane %v375_v16, 4  ;;  %v322_v28 = vrot.slane %v319_v15, 4 }
  0x8b   : > { %v335_v17 = vpop.permute.xlu1 %334  ;;  %v377_v18 = vpop.permute.xlu0 %376 }
  0x8c   : > { %v337_v20 = vrot.slane %v335_v17, 4  ;;  %v379_v21 = vrot.slane %v377_v18, 4 }
  0x8e   : > { %v341_v22 = vsel %vm339_vm1, %v335_v17, %v337_v20  ;;  %v380_v23 = vsel %vm281_vm2, %v378_v19, %v379_v21  ;;  %v383_v24 = vsel %vm381_vm3, %v377_v18, %v379_v21  ;;  %v388_v21 = vld [vmem:[%s899_s1] sm:$0xf] }
  0x8f   : > { %345 = vst [vmem:[#allocation2 + $0x20] sm:$0xc] %v341_v22  ;;  %v382_v25 = vsel %vm381_vm3, %v375_v16, %v380_v23  ;;  %387 = vst [vmem:[#allocation2 + $0x38] sm:$0x3] %v383_v24  ;;  %v321_v26 = vpop.permute.xlu1 %320  ;;  %v333_v27 = vpop.permute.xlu0 %332  ;;  %v543_v23 = vld [vmem:[%s901_s3] sm:$0x7] }
  0x90   : > { %386 = vst [vmem:[#allocation2 + $0x30] sm:$0x33] %v382_v25  ;;  %v323_v29 = vrot.slane %v321_v26, 4  ;;  %v336_v30 = vrot.slane %v333_v27, 4  ;;  %v547_v24 = vsub.s32 0, %v847_v3 }
  0x92   : > { %v324_v31 = vsel %vm281_vm2, %v322_v28, %v323_v29  ;;  %v327_v32 = vsel %vm325_vm4, %v321_v26, %v323_v29  ;;  %v338_v33 = vsel %vm281_vm2, %v336_v30, %v337_v20  ;;  %v551_v28 = vsub.s32 1, %v847_v3 }
  0x93   : > { %v326_v34 = vsel %vm325_vm4, %v319_v15, %v324_v31  ;;  %331 = vst [vmem:[#allocation2 + $0x20] sm:$0x3] %v327_v32  ;;  %v340_v35 = vsel %vm339_vm1, %v333_v27, %v338_v33  ;;  %v349_v36 = vpop.permute.xlu1 %348  ;;  %v347_v37 = vpop.permute.xlu0 %346  ;;  %v548_v33 = vrot.slane %v543_v23, %v547_v24 }
  0x94   : > { %330 = vst [vmem:[#allocation2 + $0x18] sm:$0x33] %v326_v34  ;;  %344 = vst [vmem:[#allocation2 + $0x18] sm:$0xcc] %v340_v35  ;;  %v351_v38 = vrot.slane %v349_v36, 4  ;;  %v350_v39 = vrot.slane %v347_v37, 4 }
  0x96   : > { %v355_v40 = vsel %vm353_vm5, %v349_v36, %v351_v38  ;;  %v352_v41 = vsel %vm281_vm2, %v350_v39, %v351_v38  ;;  %v756_v42 = vld [vmem:[#allocation2 + $0x38] ss:$0 sps:$4 sm:$0x33]   ;;  %v552_v39 = vrot.slane %v543_v23, %v551_v28 }
  0x97   : > { %359 = vst [vmem:[#allocation2 + $0x2c] sm:$0x3] %v355_v40  ;;  %v354_v43 = vsel %vm353_vm5, %v347_v37, %v352_v41  ;;  %v363_v44 = vpop.permute.xlu1 %362  ;;  %v361_v45 = vpop.permute.xlu0 %360  ;;  %v397_v46 = vld [vmem:[#allocation2 + $0x30] sm:$0x33]  ;;  %v457_v50 = vsel %vm449_vm6, %v756_v42, 0 }
  0x98   : > { %358 = vst [vmem:[#allocation2 + $0x24] sm:$0x33] %v354_v43  ;;  %v365_v47 = vrot.slane %v363_v44, 4  ;;  %v364_v48 = vrot.slane %v361_v45, 4  ;;  %v691_v49 = vcombine.high %v397_v46, %v397_v46  ;;  %708 = vmatpush3.bf16.msra.mxu1 %v457_v50  ;;  %v690_v51 = vcombine.low %v397_v46, %v397_v46 }
  0x99   : > { %709 = vmatprep.subr.bf16.mxu1 %v793_v11 }
  0x9a   : > { %v369_v52 = vsel %vm367_vm7, %v363_v44, %v365_v47  ;;  %v366_v53 = vsel %vm281_vm2, %v364_v48, %v365_v47  ;;  %693 = vmatprep.subr.msk.bf16.mxu0 %vm449_vm6, %v691_v49  ;;  %v451_v56 = vsel %vm449_vm6, %v690_v51, 0 }
  0x9b   : > { %373 = vst [vmem:[#allocation2 + $0x2c] sm:$0xc] %v369_v52  ;;  %v368_v54 = vsel %vm367_vm7, %v361_v45, %v366_v53  ;;  %v278_v55 = vpop.permute.xlu1 %277  ;;  %v276_v57 = vpop.permute.xlu0 %275  ;;  %470 = vmatpush1.bf16.msra.mxu0 %v451_v56 }
  0x9c   : > { %372 = vst [vmem:[#allocation2 + $0x24] sm:$0xcc] %v368_v54  ;;  %v280_v58 = vrot.slane %v278_v55, 4  ;;  %v279_v59 = vrot.slane %v276_v57, 4 }
  0x9e   : > { %v285_v60 = vsel %vm283_vm8, %v278_v55, %v280_v58  ;;  %v282_v61 = vsel %vm281_vm2, %v279_v59, %v280_v58 }
  0x9f   : > { %289 = vst [vmem:[#allocation2 + $0x8] sm:$0xc] %v285_v60  ;;  %v284_v62 = vsel %vm283_vm8, %v276_v57, %v282_v61  ;;  %v293_v63 = vpop.permute.xlu1 %292  ;;  %v291_v0 = vpop.permute.xlu0 %290 }
  0xa0   : > { %288 = vst [vmem:[#allocation2] sm:$0xcc] %v284_v62  ;;  %v295_v1 = vrot.slane %v293_v63, 4  ;;  %v294_v2 = vrot.slane %v291_v0, 4 }
  0xa2   : > { %v299_v4 = vsel %vm297_vm9, %v293_v63, %v295_v1  ;;  %v296_v5 = vsel %vm281_vm2, %v294_v2, %v295_v1  ;;  %v758_v6 = vld [vmem:[#allocation2 + $0x20] ss:$12 sps:$4 sm:$0xff]  }
  0xa3   : > { %303 = vst [vmem:[#allocation2 + $0x14] sm:$0x3] %v299_v4  ;;  %v298_v7 = vsel %vm297_vm9, %v291_v0, %v296_v5  ;;  %v307_v8 = vpop.permute.xlu1 %306  ;;  %v305_v9 = vpop.permute.xlu0 %304  ;;  %v759_v10 = vld [vmem:[#allocation2 + $0x1c] ss:$12 sps:$4 sm:$0xff]   ;;  %v761_v12 = vld [vmem:[#allocation2 + $0x18] ss:$12 sps:$4 sm:$0xff]   ;;  %710 = vmatpush3.bf16.msra.mxu1 %v758_v6 }
  0xa4   : > { %302 = vst [vmem:[#allocation2 + $0xc] sm:$0x33] %v298_v7  ;;  %v309_v13 = vrot.slane %v307_v8, 4  ;;  %v308_v14 = vrot.slane %v305_v9, 4  ;;  %471 = vmatprep.subr.bf16.mxu0 %v759_v10  ;;  %711 = vmatprep.subr.bf16.mxu1 %v793_v11  ;;  %v555_v11 = vsub.s32 2, %v847_v3 }
  0xa5   : > { %472 = vmatpush1.bf16.msra.mxu0 %v761_v12 }
  0xa6   : > { %v313_v15 = vsel %vm311_vm10, %v307_v8, %v309_v13  ;;  %v310_v16 = vsel %vm281_vm2, %v308_v14, %v309_v13  ;;  %v556_v26 = vrot.slane %v543_v23, %v555_v11 }
  0xa7   : > { %317 = vst [vmem:[#allocation2 + $0x14] sm:$0xc] %v313_v15  ;;  %v312_v17 = vsel %vm311_vm10, %v305_v9, %v310_v16 }
  0xa8   : > { %316 = vst [vmem:[#allocation2 + $0xc] sm:$0xcc] %v312_v17 }
  0xae   : > { %v762_v18 = vld [vmem:[#allocation2 + $0x8] ss:$12 sps:$4 sm:$0xff]  }
  0xaf   : > { %v763_v19 = vld [vmem:[#allocation2 + $0x4] ss:$12 sps:$4 sm:$0xff]   ;;  %v765_v20 = vld [vmem:[#allocation2] ss:$12 sps:$4 sm:$0xff]   ;;  %712 = vmatpush3.bf16.msra.mxu1 %v762_v18 }
  0xb0   : > { %473 = vmatprep.subr.bf16.mxu0 %v763_v19  ;;  %v403_v25 = vpop.permute.xlu0 %402 }
  0xb1   : > { %474 = vmatpush1.bf16.msra.mxu0 %v765_v20 }
  0xb2   : > { %714 = vmatmul.mubr.msk.bf16.vlgmr.msra.gmra.mxu1 %vm445_vm11, %v388_v21 }
  0xb4   : > { %694 = vmatmul.mubr.msk.bf16.vlgmr.msra.gmra.mxu0 %vm445_vm11, %v388_v21 }
 0x172   : > { %v534_v22 = vpop.f32.mrf.mxu1 }
 0x173   : > { %v535_v27 = vadd.f32 %v534_v22, %v403_v25 }
 0x174   : > { %v493_v29 = vpop.f32.mrf.mxu0  ;;  %v715_v30 = vpop.f32.mrf.mxu1 }
 0x175   : > { %v494_v31 = vadd.f32 %v493_v29, %v403_v25  ;;  %v542_v32 = vmax.f32 %v535_v27, 0.0 }
 0x176   : > { %v495_v34 = vpop.f32.mrf.mxu0  ;;  %v537_v35 = vpop.f32.mrf.mxu1 }
 0x177   : > { %v540_v36 = vmax.f32 %v494_v31, 0.0  ;;  %v562_v37 = vmul.f32 %v556_v26, %v542_v32  ;;  %v496_v38 = vadd.f32 %v495_v34, %v403_v25 }
 0x178   : > { %v497_v40 = vpop.f32.mrf.mxu0  ;;  %v716_v41 = vpop.f32.mrf.mxu1 }
 0x179   : > { %v702_v42 = vpack.c.bf16 %v562_v37, %v562_v37  ;;  %v541_v3 = vmax.f32 %v496_v38, 0.0  ;;  %v560_v44 = vmul.f32 %v548_v33, %v540_v36 }
 0x17a   : > { %v498_v43 = vpop.f32.mrf.mxu0 }
 0x17b   : > { %577 = vst [vmem:[%s238_s14 + $0x8] sm:$0xf] %v702_v42  ;;  %v561_v45 = vmul.f32 %v552_v39, %v541_v3 }
 0x17d   : > { %v701_v46 = vpack.c.bf16 %v561_v45, %v560_v44 }
 0x17f   : > { %576 = vst [vmem:[%s238_s14] sm:$0xff] %v701_v46 }
 0x180 PF: > { %s14_s17 = sadd.s32 1, %s788_s17   ;;  %s903_s15 = smov %s784_s16 }
 0x181   : > { %p11_p5 = scmp.ge.s32.totalorder %s14_s17, 4   ;;  %s904_s16 = smov %s906_s18 }
 0x183   :  { %13 = sbr.rel (!%p11_p5) target bundleno = 2 (0x2), region = 70 }

</bundles_post_ra>
